<compile_context>
chip_gen: v7x
topology: tpu7x:2x2x1
jax: 0.10.0
libtpu: 0.0.40
codegen_flags: <defaults>
</compile_context>

<pallas_src>
import functools
import math

import jax
import jax.numpy as jnp
from jax import lax
from jax.experimental import pallas as pl
from jax.experimental.pallas import tpu as pltpu


# ----------------------------------------------------------------------------
# helpers
# ----------------------------------------------------------------------------
def _round_up(x, m):
    return (x + m - 1) // m * m


@functools.lru_cache(maxsize=1)
def _vmem_limit_bytes():
    """Generation-aware VMEM budget (~70% of physical, capped)."""
    try:
        cap = getattr(pltpu.get_tpu_info(), "vmem_capacity_bytes", None)
        if cap:
            return min(int(cap * 0.7), 100 * 1024 * 1024)
    except Exception:
        pass
    return 48 * 1024 * 1024  # safe default: fits v7x's 64 MiB physical VMEM


# ----------------------------------------------------------------------------
# Fused MHA kernel: qkv_proj -> per-head softmax attention -> out_proj.
# One grid step per batch element; weights resident in VMEM (constant index_map).
# ----------------------------------------------------------------------------
def _fused_mha_kernel(x_ref, wqkv_ref, bqkv_ref, wout_ref, bout_ref,
                      o_ref, qkv_sc, y_sc, *, n_heads, head_dim, t_actual):
    Tp = x_ref.shape[1]
    C = n_heads * head_dim
    cd = x_ref.dtype  # MXU operand dtype (bf16 by default, f32 supported)

    # ---- fused qkv projection (f32 accumulation, store in compute dtype) ----
    qkv = jnp.dot(x_ref[0], wqkv_ref[...], preferred_element_type=jnp.float32)
    qkv_sc[...] = (qkv + bqkv_ref[...]).astype(qkv_sc.dtype)

    scale = jnp.float32(1.0 / math.sqrt(head_dim))

    # Additive key-padding bias row: one broadcast vadd per head instead of a
    # (Tp,Tp) compare+select.  -1e30 is safe because scores stay f32.
    if t_actual < Tp:
        key_ids = lax.broadcasted_iota(jnp.int32, (1, Tp), 1)
        kbias = jnp.where(key_ids < t_actual, jnp.float32(0.0), jnp.float32(-1e30))
    else:
        kbias = None

    # Static loop over heads; each head's intermediates die at its y_sc store
    # (no outs list / lane concatenate).
    for h in range(n_heads):
        lo = h * head_dim
        q = qkv_sc[:, lo:lo + head_dim]
        k = qkv_sc[:, C + lo:C + lo + head_dim]
        v = qkv_sc[:, 2 * C + lo:2 * C + lo + head_dim]

        # s = q @ k^T, contracting head_dim; f32 scores (no explicit transpose).
        s = lax.dot_general(q, k, (((1,), (1,)), ((), ())),
                            preferred_element_type=jnp.float32)
        s = s * scale                       # scale applied to f32 scores
        if kbias is not None:
            s = s + kbias
        m = jnp.max(s, axis=-1, keepdims=True)
        p = jnp.exp(s - m)
        l = jnp.sum(p, axis=-1, keepdims=True)
        y = jnp.dot(p.astype(cd), v, preferred_element_type=jnp.float32)
        y = y * pl.reciprocal(l, approx=False)   # exact: rows sum to 1
        y_sc[:, lo:lo + head_dim] = y.astype(y_sc.dtype)

    # ---- fused output projection; single lane-dense (Tp, C) store ----
    out = jnp.dot(y_sc[...], wout_ref[...], preferred_element_type=jnp.float32)
    o_ref[0] = (out + bout_ref[...]).astype(o_ref.dtype)


def fused_mha(xp, w_qkv, b_qkv, w_out, b_out, n_heads, t_actual):
    """xp:(B,Tp,C) compute dtype; biases pre-shaped (1,3C)/(1,C). Returns (B,Tp,C)."""
    B, Tp, C = xp.shape
    head_dim = C // n_heads
    kernel = functools.partial(_fused_mha_kernel, n_heads=n_heads,
                               head_dim=head_dim, t_actual=t_actual)
    return pl.pallas_call(
        kernel,
        out_shape=jax.ShapeDtypeStruct((B, Tp, C), xp.dtype),
        grid=(B,),
        in_specs=[
            pl.BlockSpec((1, Tp, C), lambda b: (b, 0, 0)),       # x (streamed per batch)
            pl.BlockSpec((C, 3 * C), lambda b: (0, 0)),          # w_qkv (VMEM-resident)
            pl.BlockSpec((1, 3 * C), lambda b: (0, 0)),          # b_qkv (resident)
            pl.BlockSpec((C, C), lambda b: (0, 0)),              # w_out (resident)
            pl.BlockSpec((1, C), lambda b: (0, 0)),              # b_out (resident)
        ],
        out_specs=pl.BlockSpec((1, Tp, C), lambda b: (b, 0, 0)),
        scratch_shapes=[
            pltpu.VMEM((Tp, 3 * C), xp.dtype),   # fused qkv slab
            pltpu.VMEM((Tp, C), xp.dtype),       # per-head attention outputs
        ],
        compiler_params=pltpu.CompilerParams(
            dimension_semantics=("parallel",),
            vmem_limit_bytes=_vmem_limit_bytes(),
        ),
    )(xp, w_qkv, b_qkv, w_out, b_out)


# ----------------------------------------------------------------------------
# Param preparation (hoisted: cast weights to compute dtype ONCE, reshape biases)
# ----------------------------------------------------------------------------
def prepare_params(params, dtype=jnp.bfloat16):
    c3 = params["b_qkv"].shape[0]
    c = params["b_out"].shape[0]
    return {
        "w_qkv": params["w_qkv"].astype(dtype),
        "b_qkv": params["b_qkv"].astype(dtype).reshape(1, c3),
        "w_out": params["w_out"].astype(dtype),
        "b_out": params["b_out"].astype(dtype).reshape(1, c),
    }


# ----------------------------------------------------------------------------
# Module forward
# ----------------------------------------------------------------------------
def vit_mha_forward(x, prepared_params, n_heads):
    """x:(B,T,C). prepared_params from prepare_params() (pre-cast, pre-shaped)."""
    B, T, C = x.shape
    cd = prepared_params["w_qkv"].dtype

    # Pad the sequence so attention tiles are (8,128)-friendly (e.g. 197 -> 256).
    # Padded key positions are masked in-kernel via the additive bias row.
    t_align = 128 if T > 64 else 8
    Tp = _round_up(T, t_align)
    xp = x.astype(cd)
    if Tp != T:
        xp = jnp.pad(xp, ((0, 0), (0, Tp - T), (0, 0)))

    y = fused_mha(xp,
                  prepared_params["w_qkv"], prepared_params["b_qkv"],
                  prepared_params["w_out"], prepared_params["b_out"],
                  n_heads, T)
    # attn_dropout / resid_dropout: identity (eval mode)
    return y[:, :T, :].astype(x.dtype)


# ----------------------------------------------------------------------------
# Pure-JAX reference
# ----------------------------------------------------------------------------
def vit_mha_reference(x, params, n_heads):
    B, T, C = x.shape
    hd = C // n_heads
    qkv = x.reshape(B * T, C) @ params["w_qkv"] + params["b_qkv"]
    qkv = qkv.reshape(B, T, 3 * C)
    q, k, v = jnp.split(qkv, 3, axis=2)

    def to_heads(t):
        return t.reshape(B, T, n_heads, hd).transpose(0, 2, 1, 3)

    q, k, v = to_heads(q), to_heads(k), to_heads(v)
    s = jnp.einsum("bhqd,bhkd->bhqk", q, k) / math.sqrt(hd)
    p = jax.nn.softmax(s, axis=-1)
    y = jnp.einsum("bhqk,bhkd->bhqd", p, v)
    y = y.transpose(0, 2, 1, 3).reshape(B * T, C)
    return (y @ params["w_out"] + params["b_out"]).reshape(B, T, C)


if __name__ == "__main__":
    # Small config consistent with the module: hidden=32, heads=4, seq=8, batch=2
    B, T, C, n_heads = 2, 8, 32, 4

    key = jax.random.PRNGKey(0)
    kx, kx2, kwq, kbq, kwo, kbo = jax.random.split(key, 6)

    x = jax.random.normal(kx, (B, T, C), dtype=jnp.float32)
    params = {
        "w_qkv": jax.random.normal(kwq, (C, 3 * C), dtype=jnp.float32) * 0.02,
        "b_qkv": jax.random.normal(kbq, (3 * C,), dtype=jnp.float32) * 0.02,
        "w_out": jax.random.normal(kwo, (C, C), dtype=jnp.float32) * 0.02,
        "b_out": jax.random.normal(kbo, (C,), dtype=jnp.float32) * 0.02,
    }

    # Cast/reshape params once (hoisted out of the forward pass).
    params_f32 = prepare_params(params, jnp.float32)
    params_bf16 = prepare_params(params, jnp.bfloat16)

    ref = jax.block_until_ready(vit_mha_reference(x, params, n_heads))

    # f32 path (exact reciprocal, f32 scores) — should match tightly
    out = jax.block_until_ready(vit_mha_forward(x, params_f32, n_heads))
    assert out.shape == (B, T, C)
    assert jnp.allclose(out, ref, atol=1e-3, rtol=1e-2), "f32 mismatch vs reference"

    # odd sequence length exercises the pad + key-bias path
    T2 = 13
    x2 = jax.random.normal(kx2, (B, T2, C), dtype=jnp.float32)
    out2 = jax.block_until_ready(vit_mha_forward(x2, params_f32, n_heads))
    ref2 = vit_mha_reference(x2, params, n_heads)
    assert out2.shape == (B, T2, C)
    assert jnp.allclose(out2, ref2, atol=1e-3, rtol=1e-2), "padded-T mismatch"

    # bf16 MXU-operand path (f32 accumulation / scores) — loose check
    out_bf = jax.block_until_ready(vit_mha_forward(x, params_bf16, n_heads))
    assert out_bf.shape == (B, T, C)
    max_err = float(jnp.max(jnp.abs(out_bf.astype(jnp.float32) - ref)))
    assert max_err < 5e-2, f"bf16 path too far from reference: {max_err}"

    print("KERNEL_OK")
</pallas_src>

<mosaic_0001>
module attributes {stable_mosaic.version = 11 : i64} {
  func.func @_fused_mha_kernel(%arg0: i32, %arg1: memref<1x8x32xf32, #tpu.memory_space<vmem>>, %arg2: memref<32x96xf32, #tpu.memory_space<vmem>>, %arg3: memref<1x96xf32, #tpu.memory_space<vmem>>, %arg4: memref<32x32xf32, #tpu.memory_space<vmem>>, %arg5: memref<1x32xf32, #tpu.memory_space<vmem>>, %arg6: memref<1x8x32xf32, #tpu.memory_space<vmem>>, %arg7: memref<8x96xf32, #tpu.memory_space<vmem>>, %arg8: memref<8x32xf32, #tpu.memory_space<vmem>>) attributes {dimension_semantics = [#tpu.dimension_semantics<parallel>], iteration_bounds = array<i64: 2>, scalar_prefetch = 0 : i64, scratch_operands = 2 : i64, tpu.core_type = #tpu.core_type<tc>, window_params = [{transform_indices = @transform_0, window_bounds = array<i64: 1, 8, 32>}, {pipeline_mode = #tpu.pipeline_mode<synchronous>, transform_indices = @transform_1, window_bounds = array<i64: 32, 96>}, {pipeline_mode = #tpu.pipeline_mode<synchronous>, transform_indices = @transform_2, window_bounds = array<i64: 1, 96>}, {pipeline_mode = #tpu.pipeline_mode<synchronous>, transform_indices = @transform_3, window_bounds = array<i64: 32, 32>}, {pipeline_mode = #tpu.pipeline_mode<synchronous>, transform_indices = @transform_4, window_bounds = array<i64: 1, 32>}, {transform_indices = @transform_5, window_bounds = array<i64: 1, 8, 32>}]} {
    %c0 = arith.constant 0 : index
    %c0_0 = arith.constant 0 : index
    %c0_1 = arith.constant 0 : index
    %0 = vector.load %arg1[%c0, %c0_0, %c0_1] : memref<1x8x32xf32, #tpu.memory_space<vmem>>, vector<1x8x32xf32>
    %1 = vector.shape_cast %0 : vector<1x8x32xf32> to vector<8x32xf32>
    %c0_2 = arith.constant 0 : index
    %c0_3 = arith.constant 0 : index
    %2 = vector.load %arg2[%c0_2, %c0_3] : memref<32x96xf32, #tpu.memory_space<vmem>>, vector<32x96xf32>
    %cst = arith.constant dense<0.000000e+00> : vector<8x96xf32>
    %3 = tpu.matmul %1, %2, %cst {dimension_numbers = #tpu.dot_dimension_numbers<[1], [0], [0], [1], [0, 0, 1, 1], [], []>} : vector<8x32xf32>, vector<32x96xf32>, vector<8x96xf32> -> vector<8x96xf32>
    %c0_4 = arith.constant 0 : index
    %c0_5 = arith.constant 0 : index
    %4 = vector.load %arg3[%c0_4, %c0_5] : memref<1x96xf32, #tpu.memory_space<vmem>>, vector<1x96xf32>
    %5 = vector.broadcast %4 : vector<1x96xf32> to vector<8x96xf32>
    %6 = arith.addf %3, %5 : vector<8x96xf32>
    %c0_6 = arith.constant 0 : index
    %c0_7 = arith.constant 0 : index
    %7 = vector.load %arg7[%c0_6, %c0_7] : memref<8x96xf32, #tpu.memory_space<vmem>>, vector<8x96xf32>
    tpu.vector_store %arg7[%c0_6, %c0_7], %6 {strides = array<i32>} : memref<8x96xf32, #tpu.memory_space<vmem>>, vector<8x96xf32>,
    %c0_8 = arith.constant 0 : index
    %c0_9 = arith.constant 0 : index
    %8 = vector.load %arg7[%c0_8, %c0_9] : memref<8x96xf32, #tpu.memory_space<vmem>>, vector<8x8xf32>
    %c0_10 = arith.constant 0 : index
    %c32 = arith.constant 32 : index
    %9 = vector.load %arg7[%c0_10, %c32] : memref<8x96xf32, #tpu.memory_space<vmem>>, vector<8x8xf32>
    %c0_11 = arith.constant 0 : index
    %c64 = arith.constant 64 : index
    %10 = vector.load %arg7[%c0_11, %c64] : memref<8x96xf32, #tpu.memory_space<vmem>>, vector<8x8xf32>
    %cst_12 = arith.constant dense<0.000000e+00> : vector<8x8xf32>
    %11 = tpu.matmul %8, %9, %cst_12 {dimension_numbers = #tpu.dot_dimension_numbers<[1], [1], [0], [0], [0, 0, 1, 0], [], []>} : vector<8x8xf32>, vector<8x8xf32>, vector<8x8xf32> -> vector<8x8xf32>
    %cst_13 = arith.constant 0.353553385 : f32
    %12 = vector.broadcast %cst_13 : f32 to vector<8x8xf32>
    %13 = arith.mulf %11, %12 : vector<8x8xf32>
    %cst_14 = arith.constant dense<0xFF800000> : vector<8xf32>
    %14 = vector.multi_reduction <maximumf>, %13, %cst_14 [1] : vector<8x8xf32> to vector<8xf32>
    %15 = vector.shape_cast %14 : vector<8xf32> to vector<8x1xf32>
    %16 = vector.broadcast %15 : vector<8x1xf32> to vector<8x8xf32>
    %17 = arith.subf %13, %16 : vector<8x8xf32>
    %18 = math.exp %17 : vector<8x8xf32>
    %cst_15 = arith.constant dense<0.000000e+00> : vector<8xf32>
    %19 = vector.multi_reduction <add>, %18, %cst_15 [1] : vector<8x8xf32> to vector<8xf32>
    %20 = vector.shape_cast %19 : vector<8xf32> to vector<8x1xf32>
    %cst_16 = arith.constant dense<0.000000e+00> : vector<8x8xf32>
    %21 = tpu.matmul %18, %10, %cst_16 {dimension_numbers = #tpu.dot_dimension_numbers<[1], [0], [0], [1], [0, 0, 1, 1], [], []>} : vector<8x8xf32>, vector<8x8xf32>, vector<8x8xf32> -> vector<8x8xf32>
    %22 = tpu.reciprocal %20 : vector<8x1xf32> -> vector<8x1xf32>
    %23 = vector.broadcast %22 : vector<8x1xf32> to vector<8x8xf32>
    %24 = arith.mulf %21, %23 : vector<8x8xf32>
    %c0_17 = arith.constant 0 : index
    %c0_18 = arith.constant 0 : index
    %25 = vector.load %arg8[%c0_17, %c0_18] : memref<8x32xf32, #tpu.memory_space<vmem>>, vector<8x8xf32>
    tpu.vector_store %arg8[%c0_17, %c0_18], %24 {strides = array<i32>} : memref<8x32xf32, #tpu.memory_space<vmem>>, vector<8x8xf32>,
    %c0_19 = arith.constant 0 : index
    %c8 = arith.constant 8 : index
    %26 = vector.load %arg7[%c0_19, %c8] : memref<8x96xf32, #tpu.memory_space<vmem>>, vector<8x8xf32>
    %c0_20 = arith.constant 0 : index
    %c40 = arith.constant 40 : index
    %27 = vector.load %arg7[%c0_20, %c40] : memref<8x96xf32, #tpu.memory_space<vmem>>, vector<8x8xf32>
    %c0_21 = arith.constant 0 : index
    %c72 = arith.constant 72 : index
    %28 = vector.load %arg7[%c0_21, %c72] : memref<8x96xf32, #tpu.memory_space<vmem>>, vector<8x8xf32>
    %cst_22 = arith.constant dense<0.000000e+00> : vector<8x8xf32>
    %29 = tpu.matmul %26, %27, %cst_22 {dimension_numbers = #tpu.dot_dimension_numbers<[1], [1], [0], [0], [0, 0, 1, 0], [], []>} : vector<8x8xf32>, vector<8x8xf32>, vector<8x8xf32> -> vector<8x8xf32>
    %cst_23 = arith.constant 0.353553385 : f32
    %30 = vector.broadcast %cst_23 : f32 to vector<8x8xf32>
    %31 = arith.mulf %29, %30 : vector<8x8xf32>
    %cst_24 = arith.constant dense<0xFF800000> : vector<8xf32>
    %32 = vector.multi_reduction <maximumf>, %31, %cst_24 [1] : vector<8x8xf32> to vector<8xf32>
    %33 = vector.shape_cast %32 : vector<8xf32> to vector<8x1xf32>
    %34 = vector.broadcast %33 : vector<8x1xf32> to vector<8x8xf32>
    %35 = arith.subf %31, %34 : vector<8x8xf32>
    %36 = math.exp %35 : vector<8x8xf32>
    %cst_25 = arith.constant dense<0.000000e+00> : vector<8xf32>
    %37 = vector.multi_reduction <add>, %36, %cst_25 [1] : vector<8x8xf32> to vector<8xf32>
    %38 = vector.shape_cast %37 : vector<8xf32> to vector<8x1xf32>
    %cst_26 = arith.constant dense<0.000000e+00> : vector<8x8xf32>
    %39 = tpu.matmul %36, %28, %cst_26 {dimension_numbers = #tpu.dot_dimension_numbers<[1], [0], [0], [1], [0, 0, 1, 1], [], []>} : vector<8x8xf32>, vector<8x8xf32>, vector<8x8xf32> -> vector<8x8xf32>
    %40 = tpu.reciprocal %38 : vector<8x1xf32> -> vector<8x1xf32>
    %41 = vector.broadcast %40 : vector<8x1xf32> to vector<8x8xf32>
    %42 = arith.mulf %39, %41 : vector<8x8xf32>
    %c0_27 = arith.constant 0 : index
    %c8_28 = arith.constant 8 : index
    %43 = vector.load %arg8[%c0_27, %c8_28] : memref<8x32xf32, #tpu.memory_space<vmem>>, vector<8x8xf32>
    tpu.vector_store %arg8[%c0_27, %c8_28], %42 {strides = array<i32>} : memref<8x32xf32, #tpu.memory_space<vmem>>, vector<8x8xf32>,
    %c0_29 = arith.constant 0 : index
    %c16 = arith.constant 16 : index
    %44 = vector.load %arg7[%c0_29, %c16] : memref<8x96xf32, #tpu.memory_space<vmem>>, vector<8x8xf32>
    %c0_30 = arith.constant 0 : index
    %c48 = arith.constant 48 : index
    %45 = vector.load %arg7[%c0_30, %c48] : memref<8x96xf32, #tpu.memory_space<vmem>>, vector<8x8xf32>
    %c0_31 = arith.constant 0 : index
    %c80 = arith.constant 80 : index
    %46 = vector.load %arg7[%c0_31, %c80] : memref<8x96xf32, #tpu.memory_space<vmem>>, vector<8x8xf32>
    %cst_32 = arith.constant dense<0.000000e+00> : vector<8x8xf32>
    %47 = tpu.matmul %44, %45, %cst_32 {dimension_numbers = #tpu.dot_dimension_numbers<[1], [1], [0], [0], [0, 0, 1, 0], [], []>} : vector<8x8xf32>, vector<8x8xf32>, vector<8x8xf32> -> vector<8x8xf32>
    %cst_33 = arith.constant 0.353553385 : f32
    %48 = vector.broadcast %cst_33 : f32 to vector<8x8xf32>
    %49 = arith.mulf %47, %48 : vector<8x8xf32>
    %cst_34 = arith.constant dense<0xFF800000> : vector<8xf32>
    %50 = vector.multi_reduction <maximumf>, %49, %cst_34 [1] : vector<8x8xf32> to vector<8xf32>
    %51 = vector.shape_cast %50 : vector<8xf32> to vector<8x1xf32>
    %52 = vector.broadcast %51 : vector<8x1xf32> to vector<8x8xf32>
    %53 = arith.subf %49, %52 : vector<8x8xf32>
    %54 = math.exp %53 : vector<8x8xf32>
    %cst_35 = arith.constant dense<0.000000e+00> : vector<8xf32>
    %55 = vector.multi_reduction <add>, %54, %cst_35 [1] : vector<8x8xf32> to vector<8xf32>
    %56 = vector.shape_cast %55 : vector<8xf32> to vector<8x1xf32>
    %cst_36 = arith.constant dense<0.000000e+00> : vector<8x8xf32>
    %57 = tpu.matmul %54, %46, %cst_36 {dimension_numbers = #tpu.dot_dimension_numbers<[1], [0], [0], [1], [0, 0, 1, 1], [], []>} : vector<8x8xf32>, vector<8x8xf32>, vector<8x8xf32> -> vector<8x8xf32>
    %58 = tpu.reciprocal %56 : vector<8x1xf32> -> vector<8x1xf32>
    %59 = vector.broadcast %58 : vector<8x1xf32> to vector<8x8xf32>
    %60 = arith.mulf %57, %59 : vector<8x8xf32>
    %c0_37 = arith.constant 0 : index
    %c16_38 = arith.constant 16 : index
    %61 = vector.load %arg8[%c0_37, %c16_38] : memref<8x32xf32, #tpu.memory_space<vmem>>, vector<8x8xf32>
    tpu.vector_store %arg8[%c0_37, %c16_38], %60 {strides = array<i32>} : memref<8x32xf32, #tpu.memory_space<vmem>>, vector<8x8xf32>,
    %c0_39 = arith.constant 0 : index
    %c24 = arith.constant 24 : index
    %62 = vector.load %arg7[%c0_39, %c24] : memref<8x96xf32, #tpu.memory_space<vmem>>, vector<8x8xf32>
    %c0_40 = arith.constant 0 : index
    %c56 = arith.constant 56 : index
    %63 = vector.load %arg7[%c0_40, %c56] : memref<8x96xf32, #tpu.memory_space<vmem>>, vector<8x8xf32>
    %c0_41 = arith.constant 0 : index
    %c88 = arith.constant 88 : index
    %64 = vector.load %arg7[%c0_41, %c88] : memref<8x96xf32, #tpu.memory_space<vmem>>, vector<8x8xf32>
    %cst_42 = arith.constant dense<0.000000e+00> : vector<8x8xf32>
    %65 = tpu.matmul %62, %63, %cst_42 {dimension_numbers = #tpu.dot_dimension_numbers<[1], [1], [0], [0], [0, 0, 1, 0], [], []>} : vector<8x8xf32>, vector<8x8xf32>, vector<8x8xf32> -> vector<8x8xf32>
    %cst_43 = arith.constant 0.353553385 : f32
    %66 = vector.broadcast %cst_43 : f32 to vector<8x8xf32>
    %67 = arith.mulf %65, %66 : vector<8x8xf32>
    %cst_44 = arith.constant dense<0xFF800000> : vector<8xf32>
    %68 = vector.multi_reduction <maximumf>, %67, %cst_44 [1] : vector<8x8xf32> to vector<8xf32>
    %69 = vector.shape_cast %68 : vector<8xf32> to vector<8x1xf32>
    %70 = vector.broadcast %69 : vector<8x1xf32> to vector<8x8xf32>
    %71 = arith.subf %67, %70 : vector<8x8xf32>
    %72 = math.exp %71 : vector<8x8xf32>
    %cst_45 = arith.constant dense<0.000000e+00> : vector<8xf32>
    %73 = vector.multi_reduction <add>, %72, %cst_45 [1] : vector<8x8xf32> to vector<8xf32>
    %74 = vector.shape_cast %73 : vector<8xf32> to vector<8x1xf32>
    %cst_46 = arith.constant dense<0.000000e+00> : vector<8x8xf32>
    %75 = tpu.matmul %72, %64, %cst_46 {dimension_numbers = #tpu.dot_dimension_numbers<[1], [0], [0], [1], [0, 0, 1, 1], [], []>} : vector<8x8xf32>, vector<8x8xf32>, vector<8x8xf32> -> vector<8x8xf32>
    %76 = tpu.reciprocal %74 : vector<8x1xf32> -> vector<8x1xf32>
    %77 = vector.broadcast %76 : vector<8x1xf32> to vector<8x8xf32>
    %78 = arith.mulf %75, %77 : vector<8x8xf32>
    %c0_47 = arith.constant 0 : index
    %c24_48 = arith.constant 24 : index
    %79 = vector.load %arg8[%c0_47, %c24_48] : memref<8x32xf32, #tpu.memory_space<vmem>>, vector<8x8xf32>
    tpu.vector_store %arg8[%c0_47, %c24_48], %78 {strides = array<i32>} : memref<8x32xf32, #tpu.memory_space<vmem>>, vector<8x8xf32>,
    %c0_49 = arith.constant 0 : index
    %c0_50 = arith.constant 0 : index
    %80 = vector.load %arg8[%c0_49, %c0_50] : memref<8x32xf32, #tpu.memory_space<vmem>>, vector<8x32xf32>
    %c0_51 = arith.constant 0 : index
    %c0_52 = arith.constant 0 : index
    %81 = vector.load %arg4[%c0_51, %c0_52] : memref<32x32xf32, #tpu.memory_space<vmem>>, vector<32x32xf32>
    %cst_53 = arith.constant dense<0.000000e+00> : vector<8x32xf32>
    %82 = tpu.matmul %80, %81, %cst_53 {dimension_numbers = #tpu.dot_dimension_numbers<[1], [0], [0], [1], [0, 0, 1, 1], [], []>} : vector<8x32xf32>, vector<32x32xf32>, vector<8x32xf32> -> vector<8x32xf32>
    %c0_54 = arith.constant 0 : index
    %c0_55 = arith.constant 0 : index
    %83 = vector.load %arg5[%c0_54, %c0_55] : memref<1x32xf32, #tpu.memory_space<vmem>>, vector<1x32xf32>
    %84 = vector.broadcast %83 : vector<1x32xf32> to vector<8x32xf32>
    %85 = arith.addf %82, %84 : vector<8x32xf32>
    %c0_56 = arith.constant 0 : index
    %c0_57 = arith.constant 0 : index
    %c0_58 = arith.constant 0 : index
    %86 = vector.load %arg6[%c0_56, %c0_57, %c0_58] : memref<1x8x32xf32, #tpu.memory_space<vmem>>, vector<1x8x32xf32>
    %87 = vector.shape_cast %86 : vector<1x8x32xf32> to vector<8x32xf32>
    %88 = vector.shape_cast %85 : vector<8x32xf32> to vector<1x8x32xf32>
    tpu.vector_store %arg6[%c0_56, %c0_57, %c0_58], %88 {strides = array<i32>} : memref<1x8x32xf32, #tpu.memory_space<vmem>>, vector<1x8x32xf32>,
    return
  }
  func.func @transform_0(%arg0: i32) -> (i32, i32, i32) {
    %c0_i32 = arith.constant 0 : i32
    %c0_i32_0 = arith.constant 0 : i32
    %c0_i32_1 = arith.constant 0 : i32
    return %arg0, %c0_i32, %c0_i32_0 : i32, i32, i32
  }
  func.func @transform_1(%arg0: i32) -> (i32, i32) {
    %c0_i32 = arith.constant 0 : i32
    %c0_i32_0 = arith.constant 0 : i32
    %c0_i32_1 = arith.constant 0 : i32
    return %c0_i32, %c0_i32_0 : i32, i32
  }
  func.func @transform_2(%arg0: i32) -> (i32, i32) {
    %c0_i32 = arith.constant 0 : i32
    %c0_i32_0 = arith.constant 0 : i32
    %c0_i32_1 = arith.constant 0 : i32
    return %c0_i32, %c0_i32_0 : i32, i32
  }
  func.func @transform_3(%arg0: i32) -> (i32, i32) {
    %c0_i32 = arith.constant 0 : i32
    %c0_i32_0 = arith.constant 0 : i32
    %c0_i32_1 = arith.constant 0 : i32
    return %c0_i32, %c0_i32_0 : i32, i32
  }
  func.func @transform_4(%arg0: i32) -> (i32, i32) {
    %c0_i32 = arith.constant 0 : i32
    %c0_i32_0 = arith.constant 0 : i32
    %c0_i32_1 = arith.constant 0 : i32
    return %c0_i32, %c0_i32_0 : i32, i32
  }
  func.func @transform_5(%arg0: i32) -> (i32, i32, i32) {
    %c0_i32 = arith.constant 0 : i32
    %c0_i32_0 = arith.constant 0 : i32
    %c0_i32_1 = arith.constant 0 : i32
    return %arg0, %c0_i32, %c0_i32_0 : i32, i32, i32
  }
}

</mosaic_0001>

<bundles_post_ra>
// kernel: tpu_custom_call.1
= control target key start
LH: loop header
LB: loop body
LE: loop exit
PB: predicated region body
PF: predicated region fallthrough
CT: control target
= control target key end

     0   :  { %10 = vsyncpa [#allocation5], 0  ;;  %s1990_s0 = inlined_call_operand.hbm [shape: f32[2,8,32], index: 0, kind: input, shape index: {}]   ;;  %s1991_s1 = inlined_call_operand.hbm [shape: f32[32,96], index: 1, kind: input, shape index: {}]   ;;  %s1992_s2 = inlined_call_operand.vmem [shape: f32[1,96], index: 2, kind: input, shape index: {}]   ;;  %s1993_s3 = inlined_call_operand.hbm [shape: f32[32,32], index: 3, kind: input, shape index: {}]   ;;  %s1994_s4 = inlined_call_operand.vmem [shape: f32[1,32], index: 4, kind: input, shape index: {}]   ;;  %s1995_s5 = inlined_call_operand.hbm [shape: f32[2,8,32], index: 5, kind: output, shape index: {}]  }
   0x1   :  { %12 = vsyncpa [#allocation5 + $0x1], 0 }
   0x2   :  { %13 = vsyncpa [#allocation8], 0 }
   0x3   :  { %14 = vsyncpa [#allocation6], 0 }
   0x4   :  { %16 = vsyncpa [#allocation6 + $0x1], 0  ;;  %s1681_s18 = smov 0   ;;  %s1683_s19 = smov 0  }
   0x5   :  { %s1685_s20 = smov 0   ;;  %s1687_s21 = smov 0  }
   0x6 LB: > { %s1702_s22 = sadd.s32 4294967295, %s1626_s21   ;;  %s1236_s23 = sadd.s32 4294967294, %s1626_s21   ;;  %s1626_s21 = sphi %s1687_s21, %s2015_s21   ;;  %s1622_s20 = sphi %s1685_s20, %s2014_s20   ;;  %s1618_s19 = sphi %s1683_s19, %s2013_s19   ;;  %s1614_s18 = sphi %s1681_s18, %s2012_s18  }
   0x7   : > { %p42_p0 = scmp.ne.s32.totalorder %s1618_s19, %s1614_s18  ;;  %p1996_p1 = scmp.eq.s32.totalorder %s1702_s22, 0 }
   0x8   : > { %p156_p3 = scmp.eq.s32.totalorder %s1236_s23, 1  ;;  %p1237_p5 = scmp.ge.s32.totalorder %s1626_s21, 1 }
   0x9   : > { %p1711_p4 = por %p1996_p1, %p42_p0  ;;  %p163_p7 = scmp.lt.s32.totalorder %s1626_s21, 3 }
   0xa   : > { %p1716_p6 = por %p156_p3, %p42_p0  ;;  %s1628_s27 = smov [#allocation7]  }
   0xb   : > { %s1999_s24 = scalar_select %p1711_p4, 1, 0 }
   0xc   : > { %s2000_s25 = scalar_select %p1716_p6, 1, 0 }
   0xd   : > { %p1721_p8 = pnand %p1237_p5, %p163_p7  ;;  %s175_s28 = sshll.u32 %s1628_s27, 4  ;;  %s1725_s28 = int_to_ptr.vmem [resolvable:$true] %s175_s28 }
   0xe   : > { %s1629_s30 = smov [#allocation9]   ;;  %s1470_s9 = scalar_lea.hbm %s1991_s1, 512 }
   0xf   : > { %p1380_p9 = pneg %p1721_p8  ;;  %s191_s6 = sshll.u32 %s1629_s30, 4  ;;  %s1736_s6 = int_to_ptr.vmem [resolvable:$true] %s191_s6 }
  0x10   : > { %p1471_p12 = scmp.ne.s32.totalorder %s1991_s1, %s1470_s9  ;;  %p1477_p5 = scmp.lt.u32.totalorder %s1470_s9, %s1991_s1 }
  0x11   : > { %p1732_p11 = pnand %p1380_p9, %p1996_p1 }
  0x13   : > { %p1472_p13 = pneg %p1732_p11 }
  0x15   : > { %p1473_p0 = pnand %p1472_p13, %p1471_p12 }
  0x17   : > { %p1474_p3 = pneg %p1473_p0 }
  0x19   : > { %p1479_p7 = pnand %p1477_p5, %p1474_p3 }
  0x1b   : > { %1482 = shalt.err (!%p1479_p7)
}
  0x1c   : > { %s1483_s14 = scalar_lea.vmem %s1725_s28, 512  ;;  %p1491_p2 = scmp.lt.s32.totalorder %s1725_s28, %s1725_s28 }
  0x1d   : > { %p1484_p9 = scmp.ne.s32.totalorder %s1725_s28, %s1483_s14  ;;  %p1492_p12 = scmp.lt.s32.totalorder %s1483_s14, %s1483_s14 }
  0x1f   : > { %p1486_p10 = pnand %p1484_p9, %p1472_p13  ;;  %p1493_p0 = por %p1492_p12, %p1491_p2 }
  0x21   : > { %p1487_p1 = pneg %p1486_p10 }
  0x23   : > { %p1494_p6 = pnand %p1493_p0, %p1487_p1 }
  0x25   : > { %1497 = shalt.err (!%p1494_p6)
}
  0x26   : > { %s1630_s15 = smov 128   ;;  %s1631_s16 = smov 8  }
  0x27   : > { %1383 = dma.hbm_to_vmem [thread:$0]  (!%p1732_p11), %s1991_s1, 512, %s1725_s28, [#allocation8], %s1630_s15, %s1630_s15, %s1631_s16  }
  0x28   : > { %s1498_s7 = scalar_lea.hbm %s1993_s3, 512 }
  0x29   : > { %p1499_p2 = scmp.ne.s32.totalorder %s1993_s3, %s1498_s7  ;;  %p1505_p10 = scmp.lt.u32.totalorder %s1498_s7, %s1993_s3 }
  0x2b   : > { %p1501_p1 = pnand %p1499_p2, %p1472_p13 }
  0x2d   : > { %p1502_p6 = pneg %p1501_p1 }
  0x2f   : > { %p1507_p3 = pnand %p1505_p10, %p1502_p6 }
  0x31   : > { %1510 = shalt.err (!%p1507_p3)
}
  0x32   : > { %s1511_s28 = scalar_lea.vmem %s1736_s6, 512  ;;  %p1519_p12 = scmp.lt.s32.totalorder %s1736_s6, %s1736_s6 }
  0x33   : > { %p1512_p5 = scmp.ne.s32.totalorder %s1736_s6, %s1511_s28  ;;  %p1520_p0 = scmp.lt.s32.totalorder %s1511_s28, %s1511_s28 }
  0x35   : > { %p1514_p7 = pnand %p1512_p5, %p1472_p13  ;;  %p1521_p2 = por %p1520_p0, %p1519_p12 }
  0x37   : > { %p1515_p9 = pneg %p1514_p7 }
  0x39   : > { %p1522_p1 = pnand %p1521_p2, %p1515_p9 }
  0x3b   : > { %1525 = shalt.err (!%p1522_p1)
}
  0x3c   : > { %1386 = dma.hbm_to_vmem [thread:$0]  (!%p1732_p11), %s1993_s3, 512, %s1736_s6, [#allocation8], %s1630_s15, %s1630_s15, %s1631_s16  }
  0x3d   : > { %s1791_s14 = sadd.s32 1, %s1626_s21   ;;  %s29_s29 = sadd.s32 1, %s1622_s20 }
  0x3e   : > { %s26_s17 = ssub.s32 %s1626_s21, %s1791_s14  ;;  %p36_p13 = scmp.ne.s32.totalorder %s1622_s20, %s1618_s19 }
  0x3f   : > { %p27_p6 = scmp.eq.s32.totalorder %s26_s17, 0  ;;  %p37_p10 = scmp.eq.s32.totalorder %s1626_s21, 0 }
  0x40   : > { %p2003_p3 = scmp.eq.s32.totalorder %s1702_s22, 1  ;;  %p1397_p7 = scmp.lt.s32.totalorder %s1626_s21, 2 }
  0x41   : > { %s1807_s27 = scalar_select %p27_p6, %s1622_s20, %s29_s29  }
  0x42   : > { %p1801_p5 = por %p2003_p3, %p36_p13  ;;  %p38_p9 = por %p37_p10, %p36_p13 }
  0x43   : > { %s208_s30 = sand.u32 1, %s1622_s20   ;;  %s1242_s6 = sshll.u32 %s1626_s21, 7 }
  0x44   : > { %s2004_s23 = scalar_select %p1801_p5, 1, 0 }
  0x45   : > { %s1241_s7 = sshll.u32 %s208_s30, 3  ;;  %s1814_s8 = scalar_lea.hbm %s1990_s0, %s1242_s6 }
  0x46   : > { %s212_s9 = scalar_lea.vmem [#allocation4], %s1241_s7  ;;  %p1818_p11 = pnand %p1397_p7, %p38_p9 }
  0x47   : > { %s219_s10 = sshll.u32 %s212_s9, 4  ;;  %s209_s28 = scalar_lea.sflag [#allocation5], %s208_s30  ;;  %s1816_s10 = int_to_ptr.vmem [resolvable:$true] %s219_s10 }
  0x48   : > { %s1526_s12 = scalar_lea.hbm %s1814_s8, 128  ;;  %p1528_p0 = pneg %p1818_p11 }
  0x49   : > { %p1527_p12 = scmp.ne.s32.totalorder %s1814_s8, %s1526_s12  ;;  %s1531_s17 = scalar_lea.hbm %s1990_s0, 256 }
  0x4a   : > { %p1532_p13 = scmp.lt.u32.totalorder %s1814_s8, %s1990_s0  ;;  %p1533_p6 = scmp.lt.u32.totalorder %s1531_s17, %s1526_s12 }
  0x4b   : > { %p1529_p2 = pnand %p1528_p0, %p1527_p12  ;;  %p1535_p3 = scmp.lt.u32.totalorder %s1526_s12, %s1814_s8 }
  0x4c   : > { %p1534_p10 = por %p1533_p6, %p1532_p13 }
  0x4d   : > { %p1530_p1 = pneg %p1529_p2 }
  0x4e   : > { %p1536_p7 = por %p1535_p3, %p1534_p10 }
  0x50   : > { %p1537_p9 = pnand %p1536_p7, %p1530_p1 }
  0x52   : > { %1540 = shalt.err (!%p1537_p9)
}
  0x53   : > { %s1541_s30 = scalar_lea.vmem %s1816_s10, 128  ;;  %s1632_s15 = smov [#allocation4]  }
  0x54   : > { %p1542_p12 = scmp.ne.s32.totalorder %s1816_s10, %s1541_s30  ;;  %s1546_s16 = sshll.u32 %s1632_s15, 4  ;;  %s1547_s16 = int_to_ptr.vmem [resolvable:$false] %s1546_s16 }
  0x55   : > { %s1548_s9 = scalar_lea.vmem %s1547_s16, 256  ;;  %p1549_p4 = scmp.lt.s32.totalorder %s1816_s10, %s1547_s16 }
  0x56   : > { %p1544_p2 = pnand %p1542_p12, %p1528_p0  ;;  %p1550_p13 = scmp.lt.s32.totalorder %s1548_s9, %s1541_s30 }
  0x58   : > { %p1545_p5 = pneg %p1544_p2  ;;  %p1551_p6 = por %p1550_p13, %p1549_p4 }
  0x5a   : > { %p1552_p10 = pnand %p1551_p6, %p1545_p5 }
  0x5c   : > { %1555 = shalt.err (!%p1552_p10)
}
  0x5d   : > { %1390 = dma.hbm_to_vmem [thread:$0]  (!%p1818_p11), %s1814_s8, 128, %s1816_s10, %s209_s28  }
  0x5e   : > { %228 = sbr.rel (%p1721_p8) target bundleno = 1776 (0x6f0), region = 40  ;;  %s1850_s12 = sand.u32 (!%p1721_p8), 1, %s1618_s19  }
  0x5f   : > { %s1244_s13 = sshll.u32 (!%p1721_p8), %s1850_s12, 3  ;;  %s231_s29 = scalar_lea.sflag (!%p1721_p8), [#allocation5], %s1850_s12 }
  0x60   : > { %s234_s17 = scalar_lea.vmem (!%p1721_p8), [#allocation4], %s1244_s13  ;;  %p2006_p4 = scmp.ne.s32.totalorder (!%p1721_p8), %s1999_s24, 0 }
  0x65   : > { %1601 = dma.done.wait (%p2006_p4), %s231_s29, 128  }
  0x66   : > { %1603 = vsyncadd (%p2006_p4), %s231_s29, 4294967168  ;;  %p2007_p5 = scmp.eq.s32.totalorder %s1702_s22, 0 }
  0x68   : > { %1605 = dma.done.wait (%p2007_p5), [#allocation8], 1024   ;;  %p2008_p8 = pmov %p2007_p5 }
  0x69   : > { %v1633_v0 = vmov 0.0|0.0   ;;  %vm1634_vm0 = vmmov 0   ;;  %v1635_v1 = vmov 0.0   ;;  %v270_v2 = vld [vmem:[#allocation7] sm:$0xff]  ;;  %v271_v3 = vld [vmem:[#allocation7 + $0x8] sm:$0xff]  ;;  %v272_v4 = vld [vmem:[#allocation7 + $0x10] sm:$0xff] }
  0x6a   : > { %1607 = vsyncadd (%p2008_p8), [#allocation8], 4294966272  ;;  %1356 = vmatprep.subr.bf16.mxu0 %v1633_v0  ;;  %1302 = vmatprep.mubr.msk.f32.mxu0 %vm1634_vm0, %v1635_v1  ;;  %v1357_v5 = vpack.c.bf16 %v271_v3, %v270_v2  ;;  %v273_v6 = vld [vmem:[#allocation7 + $0x18] sm:$0xff]  ;;  %vm281_vm1 = vcmask 261120   ;;  %v1248_v9 = vld [vmem:[%s1992_s2] ss:$0 sm:$0xff] }
  0x6b   : > { %1305 = vmatprep.subr.mxu1 %v1635_v1  ;;  %1307 = vmatprep.mubr.msk.f32.mxu1 %vm1634_vm0, %v1635_v1  ;;  %v1360_v7 = vpack.c.bf16 %v273_v6, %v272_v4  ;;  %v269_v8 = vld [vmem:[%s234_s17] sm:$0xff]  ;;  %vm355_vm2 = vcmask 785408   ;;  %s1636_s8 = smov 64   ;;  %s1637_s10 = smov 96   ;;  %vm361_vm3 = vcmask 64512   ;;  %vm697_vm4 = vcmask 130112  }
  0x6c   : > { %1358 = vmatpush3.bf16.msra.mxu0 %v1357_v5  ;;  %s1638_s11 = smov 88   ;;  %s1639_s28 = smov 120   ;;  %vm871_vm5 = vcmask 195712   ;;  %vm1045_vm6 = vcmask 261312  }
  0x6d   : > { %1359 = vmatprep.subr.bf16.mxu0 %v1633_v0  ;;  %s1640_s7 = smov 80   ;;  %s1641_s6 = smov 112  }
  0x6e   : > { %s1642_s30 = smov 72   ;;  %s1643_s15 = smov 104  }
  0x6f   : > { %s1644_s16 = smov 56   ;;  %s1645_s9 = smov 40  }
  0x70   : > { %1361 = vmatpush3.bf16.msra.mxu0 %v1360_v7  ;;  %s1646_s29 = smov 48   ;;  %v1048_v7 = vld [vmem:[#allocation9] sm:$0xff]  ;;  %s1647_s17 = smov 8  }
  0x71   : > { %1325 = vmatprep.subr.mxu0 %v1635_v1  ;;  %s1648_s24 = smov 16   ;;  %s1649_s26 = smov 24  }
  0x72   : > { %p2009_p0 = scmp.ne.s32.totalorder %s2004_s23, 0 }
  0x73   : > { %1303 = vmatmul.mubr.msk.f32.vlgmr.msra.gmra.mrb[0].mxu0 %vm281_vm1, %v269_v8  ;;  %v1049_v8 = vld [vmem:[#allocation9 + $0x8] sm:$0xff] }
  0x74   : > { %1327 = vmatprep.mubr.msk.f32.mxu0 %vm1634_vm0, %v1635_v1 }
 0x146   : > { %v351_v10 = vpop.f32.mrb[0].mxu0 }
 0x147   : > { %v352_v11 = vadd.f32 %v1248_v9, %v351_v10  ;;  %v1304_v12 = vpop.f32.mrb[1].mxu0  ;;  %v1050_v9 = vld [vmem:[#allocation9 + $0x10] sm:$0xff]  ;;  %v1051_v10 = vld [vmem:[#allocation9 + $0x18] sm:$0xff] }
 0x149   : > { %356 = vst.msk [vmem:[#allocation2] sm:$0xff] %vm355_vm2, %v352_v11 }
 0x150   : > { %v1878_v13 = vld [vmem:[#allocation2] sm:$0xff] }
 0x151   : > { %446 = vrot.lane.b32.xlu1 %v1878_v13, %s1636_s8  ;;  %359 = vrot.lane.b32.xlu0 %v1878_v13, %s1637_s10 }
 0x155   : > { %529 = vrot.lane.b32.xlu1 %v1878_v13, %s1638_s11  ;;  %s1265_s11 = sshll.u32 %s1702_s22, 7 }
 0x159   : > { %527 = vrot.lane.b32.xlu1 %v1878_v13, %s1639_s28  ;;  %s268_s28 = scalar_lea.vmem [#allocation10], %s1244_s13  ;;  %s1650_s13 = smov [#allocation10]  }
 0x15d   : > { %703 = vrot.lane.b32.xlu1 %v1878_v13, %s1640_s7  ;;  %s1147_s7 = sshll.u32 %s268_s28, 4  ;;  %s1947_s7 = int_to_ptr.vmem [resolvable:$true] %s1147_s7 }
 0x15e   : > { %s1556_s22 = scalar_lea.vmem %s1947_s7, 128 }
 0x15f   : > { %p1557_p11 = scmp.ne.s32.totalorder %s1947_s7, %s1556_s22 }
 0x161   : > { %701 = vrot.lane.b32.xlu1 %v1878_v13, %s1641_s6  ;;  %p1558_p1 = pnand %p1557_p11, %p2009_p0 }
 0x163   : > { %p1559_p3 = pneg %p1558_p1 }
 0x165   : > { %877 = vrot.lane.b32.xlu1 %v1878_v13, %s1642_s30 }
 0x169   : > { %875 = vrot.lane.b32.xlu1 %v1878_v13, %s1643_s15  ;;  %s1945_s15 = scalar_lea.hbm %s1995_s5, %s1265_s11 }
 0x1c3   : > { %v447_v14 = vpop.permute.xlu1 %446  ;;  %v360_v15 = vpop.permute.xlu0 %359 }
 0x1c4   : > { %1306 = vmatpush3.xpose.msk.msra.mxu1 %vm361_vm3, %v360_v15 }
 0x1c5   : > { %1310 = vmatprep.subr.mxu1 %v1635_v1 }
 0x1c7   : > { %v530_v16 = vpop.permute.xlu1 %529  ;;  %1308 = vmatmul.mubr.msk.f32.vlgmr.msra.gmra.mrb[0].mxu1 %vm361_vm3, %v1878_v13 }
 0x1c8   : > { %1311 = vmatpush3.msra.mxu1 %v447_v14  ;;  %1312 = vmatprep.mubr.msk.f32.mxu1 %vm1634_vm0, %v1635_v1 }
 0x1c9   : > { %1315 = vmatprep.subr.mxu1 %v1635_v1 }
 0x1cb   : > { %v528_v17 = vpop.permute.xlu1 %527 }
 0x1cf   : > { %v704_v18 = vpop.permute.xlu1 %703 }
 0x1d0   : > { %1326 = vmatpush3.xpose.msk.msra.mxu0 %vm361_vm3, %v704_v18 }
 0x1d1   : > { %1335 = vmatprep.subr.mxu0 %v1635_v1 }
 0x1d3   : > { %v702_v19 = vpop.permute.xlu1 %701 }
 0x1d4   : > { %1328 = vmatmul.mubr.msk.f32.vlgmr.msra.gmra.mrb[2].mxu0 %vm361_vm3, %v702_v19 }
 0x1d5   : > { %1337 = vmatprep.mubr.msk.f32.mxu0 %vm1634_vm0, %v1635_v1 }
 0x1d7   : > { %v878_v20 = vpop.permute.xlu1 %877 }
 0x1d8   : > { %1336 = vmatpush3.xpose.msk.msra.mxu0 %vm361_vm3, %v878_v20 }
 0x1d9   : > { %1362 = vmatprep.subr.bf16.mxu0 %v1633_v0 }
 0x1db   : > { %v876_v21 = vpop.permute.xlu1 %875 }
 0x1dc   : > { %1338 = vmatmul.mubr.msk.f32.vlgmr.msra.gmra.mrb[4].mxu0 %vm361_vm3, %v876_v21 }
 0x1dd   : > { %1353 = vmatprep.mubr.msk.f32.mxu0 %vm1634_vm0, %v1635_v1 }
 0x29a   : > { %v432_v22 = vpop.f32.mrb[0].mxu1 }
 0x29b   : > { %v436_v23 = vmul.f32 0.35355338, %v432_v22  ;;  %v1309_v24 = vpop.f32.mrb[1].mxu1 }
 0x29d   : > { %v437_v25 = vsel %vm361_vm3, %v436_v23, -inf }
 0x29e   : > { %438 = vmax.xlane.f32.xlu0 %v437_v25 }
 0x2a7   : > { %v775_v26 = vpop.f32.mrb[2].mxu0 }
 0x2a8   : > { %v1329_v27 = vpop.f32.mrb[3].mxu0  ;;  %v779_v30 = vmul.f32 0.35355338, %v775_v26 }
 0x2a9   : > { %v1262_v27 = vld [vmem:[%s1994_s4] ss:$0 sm:$0xff] }
 0x2aa   : > { %v780_v32 = vsel %vm361_vm3, %v779_v30, -inf }
 0x2af   : > { %v949_v28 = vpop.f32.mrb[4].mxu0 }
 0x2b0   : > { %v1339_v29 = vpop.f32.mrb[5].mxu0  ;;  %v953_v31 = vmul.f32 0.35355338, %v949_v28 }
 0x2b2   : > { %v954_v33 = vsel %vm361_vm3, %v953_v31, -inf }
 0x2b4   : > { %615 = vrot.lane.b32.xlu0 %v1878_v13, %s1644_s16  ;;  %s1134_s16 = scalar_lea.sflag [#allocation6], %s1850_s12 }
 0x2d3   : > { %781 = vmax.xlane.f32.xlu0 %v780_v32 }
 0x2d7   : > { %955 = vmax.xlane.f32.xlu0 %v954_v33 }
 0x2ed   : > { %963 = vrot.lane.b32.xlu0 %v1878_v13, %s1645_s9  ;;  %s1560_s9 = sshll.u32 %s1650_s13, 4  ;;  %s1561_s9 = int_to_ptr.vmem [resolvable:$false] %s1560_s9 }
 0x2ee   : > { %p1563_p7 = scmp.lt.s32.totalorder %s1947_s7, %s1561_s9 }
 0x32b   : > { %v439_v34 = vpop.xlane.xlu0 %438 }
 0x32c   : > { %v440_v35 = vsub.f32 %v436_v23, %v439_v34 }
 0x32e   : > { %v441_v36 = vmul.f32 1.442695, %v440_v35 }
 0x32f   : > { %v616_v38 = vpop.permute.xlu0 %615 }
 0x330   : > { %1454 = vpow2.f32 %v441_v36 }
 0x33a   : > { %v1455_v37 = vpop.eup %1454 }
 0x33b   : > { %1313 = vmatmul.mubr.msk.f32.vlgmr.msra.gmra.mrb[2].mxu1 %vm361_vm3, %v1455_v37  ;;  %v443_v62 = vsel %vm361_vm3, %v1455_v37, 0.0 }
 0x33c   : > { %1316 = vmatpush3.xpose.msk.msra.mxu1 %vm361_vm3, %v530_v16  ;;  %1317 = vmatprep.mubr.msk.f32.mxu1 %vm1634_vm0, %v1635_v1 }
 0x33d   : > { %1320 = vmatprep.subr.mxu1 %v1635_v1 }
 0x33f   : > { %1318 = vmatmul.mubr.msk.f32.vlgmr.msra.gmra.mrb[4].mxu1 %vm361_vm3, %v528_v17 }
 0x340   : > { %1321 = vmatpush3.msra.mxu1 %v616_v38  ;;  %1322 = vmatprep.mubr.msk.f32.mxu1 %vm1634_vm0, %v1635_v1 }
 0x341   : > { %1330 = vmatprep.subr.mxu1 %v1635_v1 }
 0x360   : > { %v782_v45 = vpop.xlane.xlu0 %781 }
 0x361   : > { %v783_v46 = vsub.f32 %v779_v30, %v782_v45 }
 0x363   : > { %v784_v47 = vmul.f32 1.442695, %v783_v46 }
 0x364   : > { %v956_v50 = vpop.xlane.xlu0 %955 }
 0x365   : > { %1456 = vpow2.f32 %v784_v47  ;;  %v957_v51 = vsub.f32 %v953_v31, %v956_v50 }
 0x367   : > { %v958_v54 = vmul.f32 1.442695, %v957_v51 }
 0x368   : > { %v964_v60 = vpop.permute.xlu0 %963 }
 0x36f   : > { %v1457_v48 = vpop.eup %1456 }
 0x370   : > { %v786_v49 = vsel %vm361_vm3, %v1457_v48, 0.0 }
 0x40e   : > { %v518_v39 = vpop.f32.mrb[2].mxu1 }
 0x40f   : > { %v1314_v40 = vpop.f32.mrb[3].mxu1 }
 0x412   : > { %v601_v41 = vpop.f32.mrb[4].mxu1 }
 0x413   : > { %v605_v42 = vmul.f32 0.35355338, %v601_v41  ;;  %v1319_v43 = vpop.f32.mrb[5].mxu1 }
 0x415   : > { %v606_v44 = vsel %vm361_vm3, %v605_v42, -inf }
 0x416   : > { %607 = vmax.xlane.f32.xlu1 %v606_v44 }
 0x427   : > { %789 = vrot.lane.b32.xlu1 %v1878_v13, %s1646_s29  ;;  %v1366_v13 = vpack.c.bf16 %v1051_v10, %v1050_v9  ;;  %s1562_s29 = scalar_lea.vmem %s1561_s9, 256 }
 0x428   : > { %p1564_p9 = scmp.lt.s32.totalorder %s1562_s29, %s1556_s22 }
 0x42a   : > { %p1565_p12 = por %p1564_p9, %p1563_p7 }
 0x42c   : > { %p1566_p2 = pnand %p1565_p12, %p1559_p3 }
 0x44b   : > { %787 = vadd.xlane.f32.xlu1 %v786_v49 }
 0x4a3   : > { %v608_v52 = vpop.xlane.xlu1 %607 }
 0x4a4   : > { %v609_v53 = vsub.f32 %v605_v42, %v608_v52 }
 0x4a6   : > { %v610_v55 = vmul.f32 1.442695, %v609_v53 }
 0x4a7   : > { %v790_v57 = vpop.permute.xlu1 %789 }
 0x4a8   : > { %1458 = vpow2.f32 %v610_v55 }
 0x4a9   : > { %1460 = vpow2.f32 %v958_v54 }
 0x4b2   : > { %v1459_v56 = vpop.eup %1458 }
 0x4b3   : > { %1323 = vmatmul.mubr.msk.f32.vlgmr.msra.gmra.mrb[6].mxu1 %vm361_vm3, %v1459_v56  ;;  %v612_v58 = vsel %vm361_vm3, %v1459_v56, 0.0  ;;  %v1461_v59 = vpop.eup %1460 }
 0x4b4   : > { %1331 = vmatpush3.msra.mxu1 %v790_v57  ;;  %613 = vadd.xlane.f32.xlu0 %v612_v58  ;;  %v960_v61 = vsel %vm361_vm3, %v1461_v59, 0.0 }
 0x4b5   : > { %1332 = vmatprep.mubr.msk.f32.mxu1 %vm1634_vm0, %v1635_v1  ;;  %1340 = vmatprep.subr.mxu1 %v1635_v1 }
 0x4b7   : > { %1333 = vmatmul.mubr.msk.f32.vlgmr.msra.gmra.mrb[8].mxu1 %vm361_vm3, %v1457_v48 }
 0x4b8   : > { %1341 = vmatpush3.msra.mxu1 %v964_v60  ;;  %961 = vadd.xlane.f32.xlu0 %v960_v61 }
 0x4b9   : > { %1342 = vmatprep.mubr.msk.f32.mxu1 %vm1634_vm0, %v1635_v1  ;;  %v1363_v1 = vpack.c.bf16 %v1049_v8, %v1048_v7 }
 0x4bb   : > { %1343 = vmatmul.mubr.msk.f32.vlgmr.msra.gmra.mrb[10].mxu1 %vm361_vm3, %v1461_v59  ;;  %1364 = vmatpush3.bf16.msra.mxu0 %v1363_v1 }
 0x4bc   : > { %444 = vadd.xlane.f32.xlu0 %v443_v62  ;;  %1365 = vmatprep.subr.bf16.mxu0 %v1633_v0 }
 0x4bf   : > { %1367 = vmatpush3.bf16.msra.mxu0 %v1366_v13 }
 0x4d8   : > { %v788_v6 = vpop.xlane.xlu1 %787 }
 0x541   : > { %v614_v63 = vpop.xlane.xlu0 %613 }
 0x545   : > { %v962_v2 = vpop.xlane.xlu0 %961 }
 0x549   : > { %v445_v3 = vpop.xlane.xlu0 %444 }
 0x54a   : > { %1462 = vrcp.f32 %v445_v3 }
 0x54b   : > { %1464 = vrcp.f32 %v614_v63 }
 0x54c   : > { %1466 = vrcp.f32 %v788_v6 }
 0x54d   : > { %1468 = vrcp.f32 %v962_v2 }
 0x554   : > { %v1463_v4 = vpop.eup %1462 }
 0x555   : > { %v523_v5 = vmul.f32 %v1463_v4, %v518_v39  ;;  %v1465_v11 = vpop.eup %1464 }
 0x556   : > { %v1467_v16 = vpop.eup %1466 }
 0x557   : > { %524 = vst.msk [vmem:[#allocation3] sm:$0xff] %vm361_vm3, %v523_v5  ;;  %v1469_v20 = vpop.eup %1468 }
 0x586   : > { %v687_v12 = vpop.f32.mrb[6].mxu1 }
 0x587   : > { %v692_v14 = vmul.f32 %v1465_v11, %v687_v12  ;;  %v1324_v15 = vpop.f32.mrb[7].mxu1 }
 0x589   : > { %694 = vrot.lane.b32.xlu0 %v692_v14, %s1647_s17 }
 0x58a   : > { %v861_v17 = vpop.f32.mrb[8].mxu1 }
 0x58b   : > { %v866_v18 = vmul.f32 %v1467_v16, %v861_v17  ;;  %v1334_v19 = vpop.f32.mrb[9].mxu1 }
 0x58d   : > { %868 = vrot.lane.b32.xlu1 %v866_v18, %s1648_s24 }
 0x58e   : > { %v1035_v21 = vpop.f32.mrb[10].mxu1 }
 0x58f   : > { %v1040_v22 = vmul.f32 %v1469_v20, %v1035_v21  ;;  %v1344_v23 = vpop.f32.mrb[11].mxu1 }
 0x591   : > { %1042 = vrot.lane.b32.xlu0 %v1040_v22, %s1649_s26 }
 0x5fb   : > { %v695_v24 = vpop.permute.xlu0 %694 }
 0x5fc   : > { %698 = vst.msk [vmem:[#allocation3] sm:$0xff] %vm697_vm4, %v695_v24 }
 0x5ff   : > { %v869_v0 = vpop.permute.xlu1 %868 }
 0x600   : > { %872 = vst.msk [vmem:[#allocation3] sm:$0xff] %vm871_vm5, %v869_v0 }
 0x603   : > { %v1043_v25 = vpop.permute.xlu0 %1042 }
 0x604   : > { %1046 = vst.msk [vmem:[#allocation3] sm:$0xff] %vm1045_vm6, %v1043_v25 }
 0x60b   : > { %v1047_v26 = vld [vmem:[#allocation3] sm:$0xff] }
 0x60c   : > { %1354 = vmatmul.mubr.msk.f32.vlgmr.msra.gmra.mrb[6].mxu0 %vm281_vm1, %v1047_v26 }
 0x6df   : > { %v1128_v28 = vpop.f32.mrb[6].mxu0 }
 0x6e0   : > { %v1129_v29 = vadd.f32 %v1262_v27, %v1128_v28  ;;  %v1355_v30 = vpop.f32.mrb[7].mxu0 }
 0x6e2   : > { %1132 = vst.msk [vmem:[%s268_s28] sm:$0xff] %vm281_vm1, %v1129_v29 }
 0x6e3   : > { %1569 = shalt.err (!%p1566_p2)
}
 0x6e4   : > { %s1570_s12 = scalar_lea.hbm %s1945_s15, 128  ;;  %s1574_s26 = scalar_lea.hbm %s1995_s5, 256 }
 0x6e5   : > { %p1571_p13 = scmp.ne.s32.totalorder %s1945_s15, %s1570_s12  ;;  %p1575_p4 = scmp.lt.u32.totalorder %s1945_s15, %s1995_s5 }
 0x6e6   : > { %p1576_p5 = scmp.lt.u32.totalorder %s1574_s26, %s1570_s12  ;;  %p1578_p11 = scmp.lt.u32.totalorder %s1570_s12, %s1945_s15 }
 0x6e7   : > { %p1572_p6 = pnand %p1571_p13, %p2009_p0 }
 0x6e8   : > { %p1577_p8 = por %p1576_p5, %p1575_p4 }
 0x6e9   : > { %p1573_p10 = pneg %p1572_p6 }
 0x6ea   : > { %p1579_p1 = por %p1578_p11, %p1577_p8 }
 0x6ec   : > { %p1580_p3 = pnand %p1579_p1, %p1573_p10 }
 0x6ee   : > { %1583 = shalt.err (!%p1580_p3)
}
 0x6ef   : > { %1378 = dma.vmem_to_hbm [thread:$0]  (%p2009_p0), %s1947_s7, 128, %s1945_s15, %s1134_s16  }
 0x6f0 PF: > { %s1159_s11 = sand.u32 1, %s1614_s18   ;;  %p2010_p7 = scmp.ne.s32.totalorder %s2000_s25, 0 }
 0x6f1   : > { %p2011_p9 = scmp.ge.s32.totalorder %s1626_s21, 2  ;;  %s1160_s28 = scalar_lea.sflag [#allocation6], %s1159_s11 }
 0x6f3   : > { %p1392_p12 = pnand %p2011_p9, %p2010_p7 }
 0x6f5   : > { %1609 = dma.done.wait (!%p1392_p12), %s1160_s28, 128  }
 0x6f6   : > { %1611 = vsyncadd (!%p1392_p12), %s1160_s28, 4294967168  ;;  %p19_p2 = scmp.ge.s32.totalorder %s1791_s14, 4   ;;  %s2012_s18 = smov %s1618_s19 }
 0x6f7   : > { %s2013_s19 = smov %s1622_s20  ;;  %s2014_s20 = smov %s1807_s27 }
 0x6f8   : > { %s2015_s21 = smov %s1791_s14  ;;  %21 = sbr.rel (!%p19_p2) target bundleno = 6 (0x6), region = 93 }
 0x6ff   :  { %1165 = vsyncpa [#allocation5], 1 }
 0x700   :  { %1167 = vsyncpa [#allocation5 + $0x1], 1 }
 0x701   :  { %1168 = vsyncpa [#allocation8], 1 }
 0x702   :  { %1169 = vsyncpa [#allocation6], 1 }
 0x703   :  { %1171 = vsyncpa [#allocation6 + $0x1], 1 }

</bundles_post_ra>
